<compile_context>
chip_gen: v6e
topology: v6e:2x2x1
jax: 0.10.0
libtpu: 0.0.40
codegen_flags: <defaults>
</compile_context>

<pallas_src>
import math
import functools

import jax
import jax.numpy as jnp
from jax.experimental import pallas as pl
from jax.experimental.pallas import tpu as pltpu


# ------------------------------ fused MHA kernel -----------------------------

def _mha_kernel(x_ref, wqkv_ref, wo_ref, bqkv_ref, bo_ref, o_ref, *,
                batch, seq, num_heads):
    B, S, H = batch, seq, num_heads
    D = x_ref.shape[-1] // 3
    d_k = D // H

    # (1) Fused q/k/v projection: one lane-dense bf16 MXU push, f32 accumulate.
    #     The block-diagonal weight applies Wq/Wk/Wv to their own input slab.
    #     1/sqrt(d_k) is already folded into the Wq block / bq host-side.
    qkv = jnp.dot(x_ref[...], wqkv_ref[...],
                  preferred_element_type=jnp.float32) + bqkv_ref[...]   # [B*S, 3D] f32

    # (2) Head split into a batched [B*H, S, d_k] tensor using static slices +
    #     a leading-dim stack (no 4-D reshape/transpose relayouts).
    def split_heads(col_off):
        return jnp.stack(
            [qkv[b * S:(b + 1) * S, col_off + h * d_k: col_off + (h + 1) * d_k]
             for b in range(B) for h in range(H)],
            axis=0)                                                      # [B*H, S, d_k] f32

    qh = split_heads(0)
    kh = split_heads(D)
    vh = split_heads(2 * D)

    # (3) Per-head scores (batched over B*H); scale already folded into q.
    s = jnp.einsum('gqe,gke->gqk', qh, kh,
                   preferred_element_type=jnp.float32)                   # [B*H, S, S]

    # max-subtracted softmax (matches the PyTorch module); divide via the EUP.
    # approx reciprocal => rows sum to 1 only to ~1e-3 (fine for inference).
    m = jnp.max(s, axis=-1, keepdims=True)
    p = jnp.exp(s - m)
    p = p * pl.reciprocal(jnp.sum(p, axis=-1, keepdims=True), approx=True)

    ctx = jnp.einsum('gqk,gke->gqe', p, vh,
                     preferred_element_type=jnp.float32)                 # [B*H, S, d_k]

    # (4) Concatenate heads back to [B*S, D]: lane concat per batch element,
    #     sublane concat across the batch.
    ctx2 = jnp.concatenate(
        [jnp.concatenate([ctx[b * H + h] for h in range(H)], axis=-1)
         for b in range(B)],
        axis=0)                                                          # [B*S, D] f32

    # (5) Output projection: single contraction; the sum over heads is folded
    #     into MXU f32 accumulation instead of a VPU reduction.
    out = jnp.dot(ctx2.astype(jnp.bfloat16), wo_ref[...],
                  preferred_element_type=jnp.float32) + bo_ref[...]      # [B*S, D]
    o_ref[...] = out


def mha_forward(q_in, k_in, v_in, params, num_heads):
    B, S, D = q_in.shape
    H = num_heads
    d_k = D // H
    scale = 1.0 / math.sqrt(d_k)

    # ---- one-time host-side weight prep ------------------------------------
    # Fold the 1/sqrt(d_k) score scale into Wq / bq.
    wq_s = params["wq"] * scale
    bq_s = params["bq"] * scale

    # Block-diagonal fused projection weight [3D, 3D] (q/k/v inputs differ).
    w_blk = jnp.zeros((3 * D, 3 * D), jnp.float32)
    w_blk = w_blk.at[0:D, 0:D].set(wq_s)
    w_blk = w_blk.at[D:2 * D, D:2 * D].set(params["wk"])
    w_blk = w_blk.at[2 * D:3 * D, 2 * D:3 * D].set(params["wv"])
    w_blk = w_blk.astype(jnp.bfloat16)                                   # [3D, 3D]

    b_cat = jnp.concatenate([bq_s, params["bk"], params["bv"]]
                            ).reshape(1, 3 * D).astype(jnp.float32)      # [1, 3D]
    wo = params["wo"].astype(jnp.bfloat16)                               # [D, D]
    bo = params["bo"].reshape(1, D).astype(jnp.float32)                  # [1, D]

    # ---- per-call activation prep: one bf16 stream [B*S, 3D] ----------------
    x_cat = jnp.concatenate([q_in, k_in, v_in], axis=-1
                            ).reshape(B * S, 3 * D).astype(jnp.bfloat16)

    kernel = functools.partial(_mha_kernel, batch=B, seq=S, num_heads=H)

    # Gridless call: whole (tiny) problem in one invocation, all operands VMEM.
    out = pl.pallas_call(
        kernel,
        out_shape=jax.ShapeDtypeStruct((B * S, D), jnp.float32),
        in_specs=[
            pl.BlockSpec(memory_space=pltpu.MemorySpace.VMEM),   # x_cat
            pl.BlockSpec(memory_space=pltpu.MemorySpace.VMEM),   # W_blk
            pl.BlockSpec(memory_space=pltpu.MemorySpace.VMEM),   # Wo
            pl.BlockSpec(memory_space=pltpu.MemorySpace.VMEM),   # b_cat
            pl.BlockSpec(memory_space=pltpu.MemorySpace.VMEM),   # bo
        ],
        out_specs=pl.BlockSpec(memory_space=pltpu.MemorySpace.VMEM),
    )(x_cat, w_blk, wo, b_cat, bo)

    return out.reshape(B, S, D)   # wrapper-side layout plumbing only


# ------------------------------ parameters -----------------------------------

def init_params(key, d_model):
    ks = jax.random.split(key, 4)

    def lin(k, fan_in, fan_out):
        bound = 1.0 / math.sqrt(fan_in)
        kw, kb = jax.random.split(k)
        w = jax.random.uniform(kw, (fan_in, fan_out), jnp.float32, -bound, bound)
        b = jax.random.uniform(kb, (fan_out,), jnp.float32, -bound, bound)
        return w, b

    wq, bq = lin(ks[0], d_model, d_model)
    wk, bk = lin(ks[1], d_model, d_model)
    wv, bv = lin(ks[2], d_model, d_model)
    wo, bo = lin(ks[3], d_model, d_model)
    return dict(wq=wq, bq=bq, wk=wk, bk=bk, wv=wv, bv=bv, wo=wo, bo=bo)


# ------------------------------ pure-JAX reference ----------------------------

def _ref_mha(q_in, k_in, v_in, params, num_heads):
    B, S, D = q_in.shape
    d_k = D // num_heads

    def proj(x, w, b):
        return (x @ w + b).reshape(B, S, num_heads, d_k).transpose(0, 2, 1, 3)

    q = proj(q_in, params["wq"], params["bq"])
    k = proj(k_in, params["wk"], params["bk"])
    v = proj(v_in, params["wv"], params["bv"])
    s = jnp.einsum("bhqd,bhkd->bhqk", q, k) / math.sqrt(d_k)
    s = s - jnp.max(s, axis=-1, keepdims=True)
    a = jnp.exp(s)
    a = a / jnp.sum(a, axis=-1, keepdims=True)
    o = jnp.einsum("bhqk,bhkd->bhqd", a, v).transpose(0, 2, 1, 3).reshape(B, S, D)
    return o @ params["wo"] + params["bo"]


# ------------------------------ main ------------------------------------------

if __name__ == "__main__":
    B, S, d_model, num_heads = 2, 8, 32, 4

    key = jax.random.PRNGKey(0)
    kq, kk, kv, kp = jax.random.split(key, 4)
    q = jax.random.normal(kq, (B, S, d_model), dtype=jnp.float32)
    k = jax.random.normal(kk, (B, S, d_model), dtype=jnp.float32)
    v = jax.random.normal(kv, (B, S, d_model), dtype=jnp.float32)
    params = init_params(kp, d_model)

    out = mha_forward(q, k, v, params, num_heads)
    out = jax.block_until_ready(out)
    assert out.shape == (B, S, d_model)

    ref = _ref_mha(q, k, v, params, num_heads)
    max_err = float(jnp.max(jnp.abs(out - ref)))
    # bf16 weight matmuls + bf16 activations + approx reciprocal vs f32 reference.
    assert jnp.allclose(out, ref, atol=5e-2, rtol=5e-2), (
        f"mismatch vs JAX reference (max abs err {max_err})")

    print("KERNEL_OK")
</pallas_src>

<mosaic_0001>
module attributes {stable_mosaic.version = 11 : i64} {
  func.func @_mha_kernel(%arg0: memref<16x96xbf16, #tpu.memory_space<vmem>>, %arg1: memref<96x96xbf16, #tpu.memory_space<vmem>>, %arg2: memref<32x32xbf16, #tpu.memory_space<vmem>>, %arg3: memref<1x96xf32, #tpu.memory_space<vmem>>, %arg4: memref<1x32xf32, #tpu.memory_space<vmem>>, %arg5: memref<16x32xf32, #tpu.memory_space<vmem>>) attributes {dimension_semantics = [], scalar_prefetch = 0 : i64, scratch_operands = 0 : i64, tpu.core_type = #tpu.core_type<tc>} {
    %c0 = arith.constant 0 : index
    %c0_0 = arith.constant 0 : index
    %0 = vector.load %arg0[%c0, %c0_0] : memref<16x96xbf16, #tpu.memory_space<vmem>>, vector<16x96xbf16>
    %c0_1 = arith.constant 0 : index
    %c0_2 = arith.constant 0 : index
    %1 = vector.load %arg1[%c0_1, %c0_2] : memref<96x96xbf16, #tpu.memory_space<vmem>>, vector<96x96xbf16>
    %cst = arith.constant dense<0.000000e+00> : vector<16x96xf32>
    %2 = tpu.matmul %0, %1, %cst {dimension_numbers = #tpu.dot_dimension_numbers<[1], [0], [0], [1], [0, 0, 1, 1], [], []>} : vector<16x96xbf16>, vector<96x96xbf16>, vector<16x96xf32> -> vector<16x96xf32>
    %c0_3 = arith.constant 0 : index
    %c0_4 = arith.constant 0 : index
    %3 = vector.load %arg3[%c0_3, %c0_4] : memref<1x96xf32, #tpu.memory_space<vmem>>, vector<1x96xf32>
    %4 = vector.broadcast %3 : vector<1x96xf32> to vector<16x96xf32>
    %5 = arith.addf %2, %4 : vector<16x96xf32>
    %6 = vector.extract_strided_slice %5 {offsets = [0, 0], sizes = [8, 8], strides = [1, 1]} : vector<16x96xf32> to vector<8x8xf32>
    %7 = vector.extract_strided_slice %5 {offsets = [0, 8], sizes = [8, 8], strides = [1, 1]} : vector<16x96xf32> to vector<8x8xf32>
    %8 = vector.extract_strided_slice %5 {offsets = [0, 16], sizes = [8, 8], strides = [1, 1]} : vector<16x96xf32> to vector<8x8xf32>
    %9 = vector.extract_strided_slice %5 {offsets = [0, 24], sizes = [8, 8], strides = [1, 1]} : vector<16x96xf32> to vector<8x8xf32>
    %10 = vector.extract_strided_slice %5 {offsets = [8, 0], sizes = [8, 8], strides = [1, 1]} : vector<16x96xf32> to vector<8x8xf32>
    %11 = vector.extract_strided_slice %5 {offsets = [8, 8], sizes = [8, 8], strides = [1, 1]} : vector<16x96xf32> to vector<8x8xf32>
    %12 = vector.extract_strided_slice %5 {offsets = [8, 16], sizes = [8, 8], strides = [1, 1]} : vector<16x96xf32> to vector<8x8xf32>
    %13 = vector.extract_strided_slice %5 {offsets = [8, 24], sizes = [8, 8], strides = [1, 1]} : vector<16x96xf32> to vector<8x8xf32>
    %14 = vector.shape_cast %6 : vector<8x8xf32> to vector<1x8x8xf32>
    %15 = vector.shape_cast %7 : vector<8x8xf32> to vector<1x8x8xf32>
    %16 = vector.shape_cast %8 : vector<8x8xf32> to vector<1x8x8xf32>
    %17 = vector.shape_cast %9 : vector<8x8xf32> to vector<1x8x8xf32>
    %18 = vector.shape_cast %10 : vector<8x8xf32> to vector<1x8x8xf32>
    %19 = vector.shape_cast %11 : vector<8x8xf32> to vector<1x8x8xf32>
    %20 = vector.shape_cast %12 : vector<8x8xf32> to vector<1x8x8xf32>
    %21 = vector.shape_cast %13 : vector<8x8xf32> to vector<1x8x8xf32>
    %22 = tpu.concatenate %14, %15, %16, %17, %18, %19, %20, %21 in 0 : vector<1x8x8xf32>, vector<1x8x8xf32>, vector<1x8x8xf32>, vector<1x8x8xf32>, vector<1x8x8xf32>, vector<1x8x8xf32>, vector<1x8x8xf32>, vector<1x8x8xf32> -> vector<8x8x8xf32>
    %23 = vector.extract_strided_slice %5 {offsets = [0, 32], sizes = [8, 8], strides = [1, 1]} : vector<16x96xf32> to vector<8x8xf32>
    %24 = vector.extract_strided_slice %5 {offsets = [0, 40], sizes = [8, 8], strides = [1, 1]} : vector<16x96xf32> to vector<8x8xf32>
    %25 = vector.extract_strided_slice %5 {offsets = [0, 48], sizes = [8, 8], strides = [1, 1]} : vector<16x96xf32> to vector<8x8xf32>
    %26 = vector.extract_strided_slice %5 {offsets = [0, 56], sizes = [8, 8], strides = [1, 1]} : vector<16x96xf32> to vector<8x8xf32>
    %27 = vector.extract_strided_slice %5 {offsets = [8, 32], sizes = [8, 8], strides = [1, 1]} : vector<16x96xf32> to vector<8x8xf32>
    %28 = vector.extract_strided_slice %5 {offsets = [8, 40], sizes = [8, 8], strides = [1, 1]} : vector<16x96xf32> to vector<8x8xf32>
    %29 = vector.extract_strided_slice %5 {offsets = [8, 48], sizes = [8, 8], strides = [1, 1]} : vector<16x96xf32> to vector<8x8xf32>
    %30 = vector.extract_strided_slice %5 {offsets = [8, 56], sizes = [8, 8], strides = [1, 1]} : vector<16x96xf32> to vector<8x8xf32>
    %31 = vector.shape_cast %23 : vector<8x8xf32> to vector<1x8x8xf32>
    %32 = vector.shape_cast %24 : vector<8x8xf32> to vector<1x8x8xf32>
    %33 = vector.shape_cast %25 : vector<8x8xf32> to vector<1x8x8xf32>
    %34 = vector.shape_cast %26 : vector<8x8xf32> to vector<1x8x8xf32>
    %35 = vector.shape_cast %27 : vector<8x8xf32> to vector<1x8x8xf32>
    %36 = vector.shape_cast %28 : vector<8x8xf32> to vector<1x8x8xf32>
    %37 = vector.shape_cast %29 : vector<8x8xf32> to vector<1x8x8xf32>
    %38 = vector.shape_cast %30 : vector<8x8xf32> to vector<1x8x8xf32>
    %39 = tpu.concatenate %31, %32, %33, %34, %35, %36, %37, %38 in 0 : vector<1x8x8xf32>, vector<1x8x8xf32>, vector<1x8x8xf32>, vector<1x8x8xf32>, vector<1x8x8xf32>, vector<1x8x8xf32>, vector<1x8x8xf32>, vector<1x8x8xf32> -> vector<8x8x8xf32>
    %40 = vector.extract_strided_slice %5 {offsets = [0, 64], sizes = [8, 8], strides = [1, 1]} : vector<16x96xf32> to vector<8x8xf32>
    %41 = vector.extract_strided_slice %5 {offsets = [0, 72], sizes = [8, 8], strides = [1, 1]} : vector<16x96xf32> to vector<8x8xf32>
    %42 = vector.extract_strided_slice %5 {offsets = [0, 80], sizes = [8, 8], strides = [1, 1]} : vector<16x96xf32> to vector<8x8xf32>
    %43 = vector.extract_strided_slice %5 {offsets = [0, 88], sizes = [8, 8], strides = [1, 1]} : vector<16x96xf32> to vector<8x8xf32>
    %44 = vector.extract_strided_slice %5 {offsets = [8, 64], sizes = [8, 8], strides = [1, 1]} : vector<16x96xf32> to vector<8x8xf32>
    %45 = vector.extract_strided_slice %5 {offsets = [8, 72], sizes = [8, 8], strides = [1, 1]} : vector<16x96xf32> to vector<8x8xf32>
    %46 = vector.extract_strided_slice %5 {offsets = [8, 80], sizes = [8, 8], strides = [1, 1]} : vector<16x96xf32> to vector<8x8xf32>
    %47 = vector.extract_strided_slice %5 {offsets = [8, 88], sizes = [8, 8], strides = [1, 1]} : vector<16x96xf32> to vector<8x8xf32>
    %48 = vector.shape_cast %40 : vector<8x8xf32> to vector<1x8x8xf32>
    %49 = vector.shape_cast %41 : vector<8x8xf32> to vector<1x8x8xf32>
    %50 = vector.shape_cast %42 : vector<8x8xf32> to vector<1x8x8xf32>
    %51 = vector.shape_cast %43 : vector<8x8xf32> to vector<1x8x8xf32>
    %52 = vector.shape_cast %44 : vector<8x8xf32> to vector<1x8x8xf32>
    %53 = vector.shape_cast %45 : vector<8x8xf32> to vector<1x8x8xf32>
    %54 = vector.shape_cast %46 : vector<8x8xf32> to vector<1x8x8xf32>
    %55 = vector.shape_cast %47 : vector<8x8xf32> to vector<1x8x8xf32>
    %56 = tpu.concatenate %48, %49, %50, %51, %52, %53, %54, %55 in 0 : vector<1x8x8xf32>, vector<1x8x8xf32>, vector<1x8x8xf32>, vector<1x8x8xf32>, vector<1x8x8xf32>, vector<1x8x8xf32>, vector<1x8x8xf32>, vector<1x8x8xf32> -> vector<8x8x8xf32>
    "tpu.trace_start"() <{level = 10 : i32, message = "gqe,gke->gqk"}> : () -> ()
    %cst_5 = arith.constant dense<0.000000e+00> : vector<8x8x8xf32>
    %57 = tpu.matmul %22, %39, %cst_5 {dimension_numbers = #tpu.dot_dimension_numbers<[2], [2], [1], [1], [0, 0, 0, 1, 1, 1], [0], [0]>} : vector<8x8x8xf32>, vector<8x8x8xf32>, vector<8x8x8xf32> -> vector<8x8x8xf32>
    "tpu.trace_stop"() : () -> ()
    %cst_6 = arith.constant dense<0xFF800000> : vector<8x8xf32>
    %58 = vector.multi_reduction <maximumf>, %57, %cst_6 [2] : vector<8x8x8xf32> to vector<8x8xf32>
    %59 = vector.shape_cast %58 : vector<8x8xf32> to vector<8x8x1xf32>
    %60 = vector.broadcast %59 : vector<8x8x1xf32> to vector<8x8x8xf32>
    %61 = arith.subf %57, %60 : vector<8x8x8xf32>
    %62 = math.exp %61 : vector<8x8x8xf32>
    %cst_7 = arith.constant dense<0.000000e+00> : vector<8x8xf32>
    %63 = vector.multi_reduction <add>, %62, %cst_7 [2] : vector<8x8x8xf32> to vector<8x8xf32>
    %64 = vector.shape_cast %63 : vector<8x8xf32> to vector<8x8x1xf32>
    %65 = tpu.reciprocal %64 {approx = true} : vector<8x8x1xf32> -> vector<8x8x1xf32>
    %66 = vector.broadcast %65 : vector<8x8x1xf32> to vector<8x8x8xf32>
    %67 = arith.mulf %62, %66 : vector<8x8x8xf32>
    "tpu.trace_start"() <{level = 10 : i32, message = "gqk,gke->gqe"}> : () -> ()
    %cst_8 = arith.constant dense<0.000000e+00> : vector<8x8x8xf32>
    %68 = tpu.matmul %67, %56, %cst_8 {dimension_numbers = #tpu.dot_dimension_numbers<[2], [1], [1], [2], [0, 0, 0, 1, 1, 2], [0], [0]>} : vector<8x8x8xf32>, vector<8x8x8xf32>, vector<8x8x8xf32> -> vector<8x8x8xf32>
    "tpu.trace_stop"() : () -> ()
    %69 = vector.extract_strided_slice %68 {offsets = [0, 0, 0], sizes = [1, 8, 8], strides = [1, 1, 1]} : vector<8x8x8xf32> to vector<1x8x8xf32>
    %70 = vector.shape_cast %69 : vector<1x8x8xf32> to vector<8x8xf32>
    %71 = vector.extract_strided_slice %68 {offsets = [1, 0, 0], sizes = [1, 8, 8], strides = [1, 1, 1]} : vector<8x8x8xf32> to vector<1x8x8xf32>
    %72 = vector.shape_cast %71 : vector<1x8x8xf32> to vector<8x8xf32>
    %73 = vector.extract_strided_slice %68 {offsets = [2, 0, 0], sizes = [1, 8, 8], strides = [1, 1, 1]} : vector<8x8x8xf32> to vector<1x8x8xf32>
    %74 = vector.shape_cast %73 : vector<1x8x8xf32> to vector<8x8xf32>
    %75 = vector.extract_strided_slice %68 {offsets = [3, 0, 0], sizes = [1, 8, 8], strides = [1, 1, 1]} : vector<8x8x8xf32> to vector<1x8x8xf32>
    %76 = vector.shape_cast %75 : vector<1x8x8xf32> to vector<8x8xf32>
    %77 = tpu.concatenate %70, %72, %74, %76 in 1 : vector<8x8xf32>, vector<8x8xf32>, vector<8x8xf32>, vector<8x8xf32> -> vector<8x32xf32>
    %78 = vector.extract_strided_slice %68 {offsets = [4, 0, 0], sizes = [1, 8, 8], strides = [1, 1, 1]} : vector<8x8x8xf32> to vector<1x8x8xf32>
    %79 = vector.shape_cast %78 : vector<1x8x8xf32> to vector<8x8xf32>
    %80 = vector.extract_strided_slice %68 {offsets = [5, 0, 0], sizes = [1, 8, 8], strides = [1, 1, 1]} : vector<8x8x8xf32> to vector<1x8x8xf32>
    %81 = vector.shape_cast %80 : vector<1x8x8xf32> to vector<8x8xf32>
    %82 = vector.extract_strided_slice %68 {offsets = [6, 0, 0], sizes = [1, 8, 8], strides = [1, 1, 1]} : vector<8x8x8xf32> to vector<1x8x8xf32>
    %83 = vector.shape_cast %82 : vector<1x8x8xf32> to vector<8x8xf32>
    %84 = vector.extract_strided_slice %68 {offsets = [7, 0, 0], sizes = [1, 8, 8], strides = [1, 1, 1]} : vector<8x8x8xf32> to vector<1x8x8xf32>
    %85 = vector.shape_cast %84 : vector<1x8x8xf32> to vector<8x8xf32>
    %86 = tpu.concatenate %79, %81, %83, %85 in 1 : vector<8x8xf32>, vector<8x8xf32>, vector<8x8xf32>, vector<8x8xf32> -> vector<8x32xf32>
    %87 = tpu.concatenate %77, %86 in 0 : vector<8x32xf32>, vector<8x32xf32> -> vector<16x32xf32>
    %88 = arith.truncf %87 : vector<16x32xf32> to vector<16x32xbf16>
    %c0_9 = arith.constant 0 : index
    %c0_10 = arith.constant 0 : index
    %89 = vector.load %arg2[%c0_9, %c0_10] : memref<32x32xbf16, #tpu.memory_space<vmem>>, vector<32x32xbf16>
    %cst_11 = arith.constant dense<0.000000e+00> : vector<16x32xf32>
    %90 = tpu.matmul %88, %89, %cst_11 {dimension_numbers = #tpu.dot_dimension_numbers<[1], [0], [0], [1], [0, 0, 1, 1], [], []>} : vector<16x32xbf16>, vector<32x32xbf16>, vector<16x32xf32> -> vector<16x32xf32>
    %c0_12 = arith.constant 0 : index
    %c0_13 = arith.constant 0 : index
    %91 = vector.load %arg4[%c0_12, %c0_13] : memref<1x32xf32, #tpu.memory_space<vmem>>, vector<1x32xf32>
    %92 = vector.broadcast %91 : vector<1x32xf32> to vector<16x32xf32>
    %93 = arith.addf %90, %92 : vector<16x32xf32>
    %c0_14 = arith.constant 0 : index
    %c0_15 = arith.constant 0 : index
    %94 = vector.load %arg5[%c0_14, %c0_15] : memref<16x32xf32, #tpu.memory_space<vmem>>, vector<16x32xf32>
    tpu.vector_store %arg5[%c0_14, %c0_15], %93 {strides = array<i32>} : memref<16x32xf32, #tpu.memory_space<vmem>>, vector<16x32xf32>,
    return
  }
}

</mosaic_0001>

<bundles_post_ra>
// kernel: tpu_custom_call.1
= control target key start
LH: loop header
LB: loop body
LE: loop exit
PB: predicated region body
PF: predicated region fallthrough
CT: control target
= control target key end

     0   :  { %10 = vsyncpa [#allocation3], 0  ;;  %s2183_s0 = inlined_call_operand.hbm [shape: bf16[16,96], index: 0, kind: input, shape index: {}]   ;;  %s2184_s1 = inlined_call_operand.hbm [shape: bf16[96,96], index: 1, kind: input, shape index: {}]   ;;  %s2185_s2 = inlined_call_operand.hbm [shape: bf16[32,32], index: 2, kind: input, shape index: {}]   ;;  %s2186_s3 = inlined_call_operand.vmem [shape: f32[1,96], index: 3, kind: input, shape index: {}]   ;;  %s2187_s4 = inlined_call_operand.vmem [shape: f32[1,32], index: 4, kind: input, shape index: {}]   ;;  %s2188_s5 = inlined_call_operand.hbm [shape: f32[16,32], index: 5, kind: output, shape index: {}]  }
   0x1   :  { %11 = vsyncpa [#allocation6], 0 }
   0x2   :  { %12 = vsyncpa [#allocation4], 0  ;;  %s1951_s18 = smov [#allocation5]   ;;  %s1952_s20 = smov [#allocation2]  }
   0x3   :  { %s30_s19 = sshll.u32 %s1951_s18, 4  ;;  %s18_s21 = sshll.u32 %s1952_s20, 4  ;;  %s31_s19 = int_to_ptr.vmem [resolvable:$true] %s30_s19  ;;  %s19_s21 = int_to_ptr.vmem [resolvable:$true] %s18_s21 }
   0x4   :  { %s1873_s22 = scalar_lea.vmem %s31_s19, 768  ;;  %p1878_p1 = scmp.lt.s32.totalorder %s31_s19, %s31_s19 }
   0x5   :  { %p1874_p0 = scmp.ne.s32.totalorder %s31_s19, %s1873_s22  ;;  %p1879_p2 = scmp.lt.s32.totalorder %s1873_s22, %s1873_s22 }
   0x7   :  { %p1880_p3 = por %p1879_p2, %p1878_p1 }
   0x9   :  { %p1881_p4 = pnand %p1880_p3, %p1874_p0 }
   0xb   :  { %1884 = shalt.err (!%p1881_p4)
}
   0xc   :  { %s1953_s23 = smov 64   ;;  %s1954_s24 = smov 4  }
   0xd   :  { %36 = dma.hbm_to_vmem [thread:$0]  %s2184_s1, 768, %s31_s19, [#allocation6], %s1953_s23, %s1953_s23, %s1954_s24  }
   0xe   :  { %s1893_s27 = scalar_lea.vmem %s19_s21, 128  ;;  %p1898_p6 = scmp.lt.s32.totalorder %s19_s21, %s19_s21 }
   0xf   :  { %p1894_p5 = scmp.ne.s32.totalorder %s19_s21, %s1893_s27  ;;  %p1899_p7 = scmp.lt.s32.totalorder %s1893_s27, %s1893_s27 }
  0x11   :  { %p1900_p8 = por %p1899_p7, %p1898_p6 }
  0x13   :  { %p1901_p9 = pnand %p1900_p8, %p1894_p5 }
  0x15   :  { %1904 = shalt.err (!%p1901_p9)
}
  0x16   :  { %24 = dma.hbm_to_vmem [thread:$0]  %s2183_s0, 128, %s19_s21, [#allocation3], %s1953_s23, %s1953_s23, %s1954_s24  }
  0x17   :  { %s1955_s30 = smov [#allocation7]  }
  0x18   :  { %s42_s6 = sshll.u32 %s1955_s30, 4  ;;  %s43_s6 = int_to_ptr.vmem [resolvable:$true] %s42_s6 }
  0x19   :  { %s1913_s7 = scalar_lea.vmem %s43_s6, 256  ;;  %p1918_p11 = scmp.lt.s32.totalorder %s43_s6, %s43_s6 }
  0x1a   :  { %p1914_p10 = scmp.ne.s32.totalorder %s43_s6, %s1913_s7  ;;  %p1919_p12 = scmp.lt.s32.totalorder %s1913_s7, %s1913_s7 }
  0x1c   :  { %p1920_p13 = por %p1919_p12, %p1918_p11 }
  0x1e   :  { %p1921_p0 = pnand %p1920_p13, %p1914_p10 }
  0x20   :  { %1924 = shalt.err (!%p1921_p0)
}
  0x21   :  { %48 = dma.hbm_to_vmem [thread:$0]  %s2185_s2, 256, %s43_s6, [#allocation6], %s1953_s23, %s1953_s23, %s1954_s24  }
  0x22   :  { %1945 = dma.done.wait [#allocation3], 128  }
  0x23   :  { %1946 = vsyncadd [#allocation3], 4294967168 }
  0x24   :  { %1947 = dma.done.wait [#allocation6], 1024  }
  0x25   :  { %1948 = vsyncadd [#allocation6], 4294966272  ;;  %v1956_v0 = vmov 0.0   ;;  %vm1957_vm0 = vmmov 0   ;;  %v1824_v1 = vld [vmem:[#allocation5 + $0x28] sm:$0xff]   ;;  %v1825_v2 = vld [vmem:[#allocation5 + $0x20] sm:$0xff]  }
  0x26   :  { %1689 = vmatprep.subr.bf16.mxu0 %v1956_v0  ;;  %1701 = vmatprep.mubr.msk.bf16.mxu0 %vm1957_vm0, %v1956_v0  ;;  %v1826_v3 = vld [vmem:[#allocation5 + $0x18] sm:$0xff]   ;;  %v1827_v4 = vld [vmem:[#allocation5 + $0x10] sm:$0xff]   ;;  %v1828_v5 = vld [vmem:[#allocation5 + $0x8] sm:$0xff]   ;;  %vm125_vm1 = vcmask 785408   ;;  %s1958_s9 = smov 104   ;;  %s1959_s10 = smov 120  }
  0x27   :  { %1710 = vmatprep.subr.mxu1 %v1956_v0  ;;  %1712 = vmatprep.mubr.msk.f32.mxu1 %vm1957_vm0, %v1956_v0  ;;  %v1829_v6 = vld [vmem:[#allocation5] sm:$0xff]   ;;  %v1830_v7 = vld [vmem:[#allocation2] sm:$0xff]   ;;  %s1960_s11 = smov 112   ;;  %vm186_vm2 = vcmask 64512   ;;  %s1962_s12 = smov 16   ;;  %vm1502_vm3 = vcmask 130048  }
  0x28   :  { %1690 = vmatpush3.bf16.msra.mxu0 %v1824_v1  ;;  %v1610_v8 = vld [vmem:[%s2186_s3] ss:$0 sm:$0xff]  ;;  %s1961_s3 = smov 96   ;;  %s1963_s13 = smov 8   ;;  %vm1504_vm4 = vcmask 195584   ;;  %vm1545_vm5 = vcmask 261120  }
  0x29   :  { %1691 = vmatprep.subr.bf16.mxu0 %v1956_v0  ;;  %s1964_s14 = smov 24   ;;  %s1965_s17 = smov [#allocation8]  }
  0x2a   :  { %s1597_s18 = sshll.u32 %s1965_s17, 4  ;;  %s1598_s18 = int_to_ptr.vmem [resolvable:$true] %s1597_s18 }
  0x2b   :  { %s1925_s19 = scalar_lea.vmem %s1598_s18, 256  ;;  %p1930_p2 = scmp.lt.s32.totalorder %s1598_s18, %s1598_s18 }
  0x2c   :  { %1692 = vmatpush3.bf16.msra.mxu0 %v1825_v2  ;;  %p1926_p1 = scmp.ne.s32.totalorder %s1598_s18, %s1925_s19  ;;  %p1931_p3 = scmp.lt.s32.totalorder %s1925_s19, %s1925_s19 }
  0x2d   :  { %1693 = vmatprep.subr.bf16.mxu0 %v1956_v0 }
  0x2e   :  { %p1932_p4 = por %p1931_p3, %p1930_p2 }
  0x30   :  { %1694 = vmatpush3.bf16.msra.mxu0 %v1826_v3  ;;  %p1933_p5 = pnand %p1932_p4, %p1926_p1 }
  0x31   :  { %1695 = vmatprep.subr.bf16.mxu0 %v1956_v0 }
  0x34   :  { %1696 = vmatpush3.bf16.msra.mxu0 %v1827_v4 }
  0x35   :  { %1697 = vmatprep.subr.bf16.mxu0 %v1956_v0 }
  0x38   :  { %1698 = vmatpush3.bf16.msra.mxu0 %v1828_v5 }
  0x39   :  { %1699 = vmatprep.subr.bf16.mxu0 %v1956_v0 }
  0x3c   :  { %1700 = vmatpush3.bf16.msra.mxu0 %v1829_v6 }
  0x3d   :  { %1705 = vmatprep.subr.mxu0 %v1956_v0 }
  0x3f   :  { %1702 = vmatmul.mubr.msk.bf16.vlgmr.msra.gmra.mxu0 %vm125_vm1, %v1830_v7 }
  0x40   :  { %1707 = vmatprep.mubr.msk.f32.mxu0 %vm1957_vm0, %v1956_v0 }
  0xff   :  { %v163_v9 = vpop.f32.mrf.mxu0 }
 0x100   :  { %v2029_v10 = vadd.f32 %v1610_v8, %v163_v9 }
 0x101   :  { %v1703_v11 = vpop.f32.mrf.mxu0 }
 0x102   :  { %175 = vrot.lane.b32.xlu1 %v2029_v10, %s1958_s9  ;;  %171 = vrot.lane.b32.xlu0 %v2029_v10, %s1959_s10 }
 0x103   :  { %v166_v12 = vpop.f32.mrf.mxu0 }
 0x104   :  { %v2033_v13 = vadd.f32 %v1610_v8, %v166_v12 }
 0x105   :  { %v1704_v14 = vpop.f32.mrf.mxu0 }
 0x106   :  { %173 = vrot.lane.b32.xlu0 %v2029_v10, %s1960_s11  ;;  %178 = vrot.lane.b32.xlu1 %v2033_v13, %s1959_s10 }
 0x10a   :  { %180 = vrot.lane.b32.xlu0 %v2033_v13, %s1960_s11  ;;  %182 = vrot.lane.b32.xlu1 %v2033_v13, %s1958_s9 }
 0x174   :  { %v2039_v15 = vpop.permute.xlu0 %171  ;;  %v2042_v16 = vpop.permute.xlu1 %175 }
 0x175   :  { %261 = vrot.lane.b32.xlu0 %v2039_v15, %s1961_s3 }
 0x178   :  { %v2044_v17 = vpop.permute.xlu0 %173  ;;  %v2050_v18 = vpop.permute.xlu1 %178 }
 0x179   :  { %184 = vrot.lane.b32.xlu0 %v2029_v10, %s1961_s3  ;;  %337 = vrot.lane.b32.xlu1 %v2044_v17, %s1961_s3 }
 0x17c   :  { %v2052_v19 = vpop.permute.xlu0 %180  ;;  %v2056_v20 = vpop.permute.xlu1 %182 }
 0x17d   :  { %489 = vrot.lane.b32.xlu0 %v2033_v13, %s1961_s3  ;;  %413 = vrot.lane.b32.xlu1 %v2042_v16, %s1961_s3 }
 0x181   :  { %641 = vrot.lane.b32.xlu0 %v2052_v19, %s1961_s3  ;;  %565 = vrot.lane.b32.xlu1 %v2050_v18, %s1961_s3 }
 0x185   :  { %717 = vrot.lane.b32.xlu1 %v2056_v20, %s1961_s3 }
 0x1e7   :  { %v262_v21 = vpop.permute.xlu0 %261 }
 0x1e8   :  { %1711 = vmatpush3.xpose.msk.msra.mxu1 %vm186_vm2, %v262_v21 }
 0x1e9   :  { %1715 = vmatprep.subr.mxu1 %v1956_v0 }
 0x1eb   :  { %1713 = vmatmul.mubr.msk.f32.vlgmr.msra.gmra.mxu1 %vm186_vm2, %v2039_v15  ;;  %v185_v22 = vpop.permute.xlu0 %184  ;;  %v338_v23 = vpop.permute.xlu1 %337 }
 0x1ec   :  { %1706 = vmatpush3.xpose.msk.msra.mxu0 %vm186_vm2, %v185_v22  ;;  %1716 = vmatpush3.xpose.msk.msra.mxu1 %vm186_vm2, %v338_v23 }
 0x1ed   :  { %1717 = vmatprep.mubr.msk.f32.mxu1 %vm1957_vm0, %v1956_v0  ;;  %1720 = vmatprep.subr.mxu1 %v1956_v0 }
 0x1ee   :  { %1740 = vmatprep.subr.mxu0 %v1956_v0 }
 0x1ef   :  { %1708 = vmatmul.mubr.msk.f32.vlgmr.msra.gmra.mxu0 %vm186_vm2, %v2029_v10  ;;  %1718 = vmatmul.mubr.msk.f32.vlgmr.msra.gmra.mxu1 %vm186_vm2, %v2044_v17  ;;  %v414_v24 = vpop.permute.xlu1 %413  ;;  %v490_v25 = vpop.permute.xlu0 %489 }
 0x1f0   :  { %1721 = vmatpush3.xpose.msk.msra.mxu1 %vm186_vm2, %v414_v24  ;;  %1722 = vmatprep.mubr.msk.f32.mxu1 %vm1957_vm0, %v1956_v0 }
 0x1f1   :  { %1725 = vmatprep.subr.mxu1 %v1956_v0  ;;  %1742 = vmatprep.mubr.msk.f32.mxu0 %vm1957_vm0, %v1956_v0 }
 0x1f3   :  { %1723 = vmatmul.mubr.msk.f32.vlgmr.msra.gmra.mxu1 %vm186_vm2, %v2042_v16  ;;  %v566_v26 = vpop.permute.xlu1 %565  ;;  %v642_v28 = vpop.permute.xlu0 %641 }
 0x1f4   :  { %1726 = vmatpush3.xpose.msk.msra.mxu1 %vm186_vm2, %v490_v25  ;;  %1727 = vmatprep.mubr.msk.f32.mxu1 %vm1957_vm0, %v1956_v0 }
 0x1f5   :  { %1730 = vmatprep.subr.mxu1 %v1956_v0 }
 0x1f7   :  { %1728 = vmatmul.mubr.msk.f32.vlgmr.msra.gmra.mxu1 %vm186_vm2, %v2033_v13  ;;  %v718_v27 = vpop.permute.xlu1 %717 }
 0x1f8   :  { %1731 = vmatpush3.xpose.msk.msra.mxu1 %vm186_vm2, %v566_v26  ;;  %1741 = vmatpush3.xpose.msk.msra.mxu0 %vm186_vm2, %v718_v27 }
 0x1f9   :  { %1732 = vmatprep.mubr.msk.f32.mxu1 %vm1957_vm0, %v1956_v0  ;;  %1735 = vmatprep.subr.mxu1 %v1956_v0 }
 0x1fa   :  { %1750 = vmatprep.subr.mxu0 %v1956_v0 }
 0x1fb   :  { %1733 = vmatmul.mubr.msk.f32.vlgmr.msra.gmra.mxu1 %vm186_vm2, %v2050_v18  ;;  %1743 = vmatmul.mubr.msk.f32.vlgmr.msra.gmra.mxu0 %vm186_vm2, %v2056_v20 }
 0x1fc   :  { %1736 = vmatpush3.xpose.msk.msra.mxu1 %vm186_vm2, %v642_v28  ;;  %1737 = vmatprep.mubr.msk.f32.mxu1 %vm1957_vm0, %v1956_v0 }
 0x1fd   :  { %1745 = vmatprep.subr.mxu1 %v1956_v0  ;;  %1752 = vmatprep.mubr.msk.f32.mxu0 %vm1957_vm0, %v1956_v0 }
 0x1ff   :  { %1738 = vmatmul.mubr.msk.f32.vlgmr.msra.gmra.mxu1 %vm186_vm2, %v2052_v19 }
 0x200   :  { %1747 = vmatprep.mubr.msk.f32.mxu1 %vm1957_vm0, %v1956_v0 }
 0x2ab   :  { %v333_v29 = vpop.f32.mrf.mxu1 }
 0x2ac   :  { %v796_v30 = vsel %vm186_vm2, %v333_v29, -inf }
 0x2ad   :  { %v1714_v31 = vpop.f32.mrf.mxu1  ;;  %797 = vmax.xlane.f32.xlu1 %v796_v30 }
 0x2af   :  { %v257_v32 = vpop.f32.mrf.mxu0  ;;  %v409_v33 = vpop.f32.mrf.mxu1 }
 0x2b0   :  { %v793_v34 = vsel %vm186_vm2, %v257_v32, -inf  ;;  %v799_v38 = vsel %vm186_vm2, %v409_v33, -inf }
 0x2b1   :  { %v1719_v35 = vpop.f32.mrf.mxu1  ;;  %794 = vmax.xlane.f32.xlu0 %v793_v34  ;;  %v1709_v36 = vpop.f32.mrf.mxu0 }
 0x2b3   :  { %v485_v37 = vpop.f32.mrf.mxu1 }
 0x2b4   :  { %v802_v42 = vsel %vm186_vm2, %v485_v37, -inf }
 0x2b5   :  { %v1724_v39 = vpop.f32.mrf.mxu1  ;;  %800 = vmax.xlane.f32.xlu0 %v799_v38 }
 0x2b7   :  { %v561_v40 = vpop.f32.mrf.mxu1 }
 0x2b8   :  { %v805_v41 = vsel %vm186_vm2, %v561_v40, -inf }
 0x2b9   :  { %806 = vmax.xlane.f32.xlu1 %v805_v41  ;;  %v1729_v43 = vpop.f32.mrf.mxu1  ;;  %803 = vmax.xlane.f32.xlu0 %v802_v42 }
 0x2bb   :  { %v637_v44 = vpop.f32.mrf.mxu1  ;;  %v789_v45 = vpop.f32.mrf.mxu0 }
 0x2bc   :  { %v808_v46 = vsel %vm186_vm2, %v637_v44, -inf  ;;  %v814_v51 = vsel %vm186_vm2, %v789_v45, -inf }
 0x2bd   :  { %v1734_v47 = vpop.f32.mrf.mxu1  ;;  %809 = vmax.xlane.f32.xlu0 %v808_v46  ;;  %v1744_v48 = vpop.f32.mrf.mxu0 }
 0x2bf   :  { %v713_v49 = vpop.f32.mrf.mxu1 }
 0x2c0   :  { %v811_v50 = vsel %vm186_vm2, %v713_v49, -inf }
 0x2c1   :  { %812 = vmax.xlane.f32.xlu1 %v811_v50  ;;  %v1739_v52 = vpop.f32.mrf.mxu1  ;;  %815 = vmax.xlane.f32.xlu0 %v814_v51 }
 0x2d2   :  { %881 = vrot.lane.b32.xlu1 %v2029_v10, %s1953_s23 }
 0x2d6   :  { %1033 = vrot.lane.b32.xlu1 %v2044_v17, %s1953_s23 }
 0x2d7   :  { %957 = vrot.lane.b32.xlu0 %v2039_v15, %s1953_s23 }
 0x2da   :  { %1109 = vrot.lane.b32.xlu1 %v2042_v16, %s1953_s23 }
 0x2db   :  { %1185 = vrot.lane.b32.xlu0 %v2033_v13, %s1953_s23 }
 0x2de   :  { %1261 = vrot.lane.b32.xlu1 %v2050_v18, %s1953_s23 }
 0x336   :  { %v798_v53 = vpop.xlane.xlu1 %797 }
 0x337   :  { %v818_v54 = vsub.f32 %v333_v29, %v798_v53 }
 0x339   :  { %v827_v55 = vmul.f32 1.442695, %v818_v54 }
 0x33a   :  { %v795_v56 = vpop.xlane.xlu0 %794 }
 0x33b   :  { %1833 = vpow2.f32 %v827_v55  ;;  %v817_v57 = vsub.f32 %v257_v32, %v795_v56 }
 0x33d   :  { %v825_v58 = vmul.f32 1.442695, %v817_v57 }
 0x33e   :  { %v801_v59 = vpop.xlane.xlu0 %800 }
 0x33f   :  { %1835 = vpow2.f32 %v825_v58  ;;  %v819_v60 = vsub.f32 %v409_v33, %v801_v59 }
 0x341   :  { %v829_v61 = vmul.f32 1.442695, %v819_v60 }
 0x342   :  { %v807_v62 = vpop.xlane.xlu1 %806  ;;  %v804_v63 = vpop.xlane.xlu0 %803 }
 0x343   :  { %1837 = vpow2.f32 %v829_v61  ;;  %v821_v1 = vsub.f32 %v561_v40, %v807_v62  ;;  %v820_v6 = vsub.f32 %v485_v37, %v804_v63 }
 0x345   :  { %v833_v2 = vmul.f32 1.442695, %v821_v1  ;;  %v831_v15 = vmul.f32 1.442695, %v820_v6 }
 0x346   :  { %v810_v3 = vpop.xlane.xlu0 %809 }
 0x347   :  { %1839 = vpow2.f32 %v833_v2  ;;  %v822_v16 = vsub.f32 %v637_v44, %v810_v3 }
 0x348   :  { %v1834_v4 = vpop.eup %1833 }
 0x349   :  { %v844_v5 = vsel %vm186_vm2, %v1834_v4, 0.0  ;;  %v835_v23 = vmul.f32 1.442695, %v822_v16 }
 0x34a   :  { %v813_v7 = vpop.xlane.xlu1 %812  ;;  %845 = vadd.xlane.f32.xlu0 %v844_v5  ;;  %v816_v8 = vpop.xlane.xlu0 %815 }
 0x34b   :  { %v823_v9 = vsub.f32 %v713_v49, %v813_v7  ;;  %v824_v10 = vsub.f32 %v789_v45, %v816_v8  ;;  %v1831_v8 = vld [vmem:[#allocation7 + $0x8] sm:$0xff]  }
 0x34c   :  { %v1836_v11 = vpop.eup %1835 }
 0x34d   :  { %v837_v12 = vmul.f32 1.442695, %v823_v9  ;;  %v839_v13 = vmul.f32 1.442695, %v824_v10  ;;  %v841_v14 = vsel %vm186_vm2, %v1836_v11, 0.0 }
 0x34e   :  { %v882_v17 = vpop.permute.xlu1 %881  ;;  %842 = vadd.xlane.f32.xlu1 %v841_v14  ;;  %v958_v18 = vpop.permute.xlu0 %957 }
 0x34f   :  { %1841 = vpow2.f32 %v837_v12  ;;  %1746 = vmatpush3.msra.mxu1 %v882_v17  ;;  %1751 = vmatpush3.msra.mxu0 %v958_v18 }
 0x350   :  { %v1838_v21 = vpop.eup %1837  ;;  %1843 = vpow2.f32 %v839_v13  ;;  %1760 = vmatprep.subr.mxu0 %v1956_v0  ;;  %1755 = vmatprep.subr.mxu1 %v1956_v0 }
 0x351   :  { %v847_v22 = vsel %vm186_vm2, %v1838_v21, 0.0  ;;  %1845 = vpow2.f32 %v831_v15 }
 0x352   :  { %848 = vadd.xlane.f32.xlu1 %v847_v22  ;;  %1847 = vpow2.f32 %v835_v23  ;;  %v1034_v34 = vpop.permute.xlu1 %1033  ;;  %v1186_v36 = vpop.permute.xlu0 %1185 }
 0x354   :  { %v1840_v24 = vpop.eup %1839 }
 0x355   :  { %v853_v25 = vsel %vm186_vm2, %v1840_v24, 0.0 }
 0x356   :  { %854 = vadd.xlane.f32.xlu1 %v853_v25  ;;  %v1110_v35 = vpop.permute.xlu1 %1109 }
 0x35a   :  { %v1262_v37 = vpop.permute.xlu1 %1261 }
 0x35c   :  { %v1842_v26 = vpop.eup %1841 }
 0x35d   :  { %v2133_v27 = vpop.eup %1843  ;;  %v859_v28 = vsel %vm186_vm2, %v1842_v26, 0.0 }
 0x35e   :  { %860 = vadd.xlane.f32.xlu1 %v859_v28  ;;  %v862_v29 = vsel %vm186_vm2, %v2133_v27, 0.0  ;;  %v1846_v30 = vpop.eup %1845 }
 0x35f   :  { %863 = vadd.xlane.f32.xlu0 %v862_v29  ;;  %v850_v31 = vsel %vm186_vm2, %v1846_v30, 0.0  ;;  %v1848_v32 = vpop.eup %1847 }
 0x360   :  { %v856_v33 = vsel %vm186_vm2, %v1848_v32, 0.0 }
 0x363   :  { %851 = vadd.xlane.f32.xlu0 %v850_v31 }
 0x367   :  { %857 = vadd.xlane.f32.xlu0 %v856_v33 }
 0x36f   :  { %1413 = vrot.lane.b32.xlu1 %v2056_v20, %s1953_s23 }
 0x37d   :  { %1337 = vrot.lane.b32.xlu0 %v2052_v19, %s1953_s23 }
 0x3d3   :  { %v846_v38 = vpop.xlane.xlu0 %845 }
 0x3d4   :  { %1849 = vrcp.f32 %v846_v38 }
 0x3d7   :  { %v843_v39 = vpop.xlane.xlu1 %842 }
 0x3d8   :  { %1851 = vrcp.f32 %v843_v39 }
 0x3db   :  { %v849_v40 = vpop.xlane.xlu1 %848 }
 0x3dc   :  { %1853 = vrcp.f32 %v849_v40 }
 0x3df   :  { %v855_v41 = vpop.xlane.xlu1 %854 }
 0x3e0   :  { %1855 = vrcp.f32 %v855_v41 }
 0x3e1   :  { %v1850_v42 = vpop.eup %1849 }
 0x3e2   :  { %v874_v43 = vmul.f32 %v1850_v42, %v1834_v4 }
 0x3e4   :  { %1753 = vmatmul.mubr.msk.f32.vlgmr.msra.gmra.mxu0 %vm186_vm2, %v874_v43 }
 0x3e5   :  { %v1852_v20 = vpop.eup %1851  ;;  %1761 = vmatpush3.msra.mxu0 %v1110_v35  ;;  %1762 = vmatprep.mubr.msk.f32.mxu0 %vm1957_vm0, %v1956_v0 }
 0x3e6   :  { %v873_v19 = vmul.f32 %v1852_v20, %v1836_v11  ;;  %1770 = vmatprep.subr.mxu0 %v1956_v0  ;;  %v1832_v11 = vld [vmem:[#allocation7] sm:$0xff]  }
 0x3e7   :  { %v861_v44 = vpop.xlane.xlu1 %860 }
 0x3e8   :  { %1857 = vrcp.f32 %v861_v44  ;;  %v864_v45 = vpop.xlane.xlu0 %863  ;;  %1748 = vmatmul.mubr.msk.f32.vlgmr.msra.gmra.mxu1 %vm186_vm2, %v873_v19 }
 0x3e9   :  { %v1854_v46 = vpop.eup %1853  ;;  %1756 = vmatpush3.msra.mxu1 %v1034_v34  ;;  %1757 = vmatprep.mubr.msk.f32.mxu1 %vm1957_vm0, %v1956_v0 }
 0x3ea   :  { %1765 = vmatprep.subr.mxu1 %v1956_v0  ;;  %v875_v47 = vmul.f32 %v1854_v46, %v1838_v21 }
 0x3eb   :  { %v1414_v60 = vpop.permute.xlu1 %1413 }
 0x3ec   :  { %v852_v48 = vpop.xlane.xlu0 %851  ;;  %1758 = vmatmul.mubr.msk.f32.vlgmr.msra.gmra.mxu1 %vm186_vm2, %v875_v47 }
 0x3ed   :  { %v1856_v49 = vpop.eup %1855  ;;  %1859 = vrcp.f32 %v852_v48  ;;  %1766 = vmatpush3.msra.mxu1 %v1186_v36  ;;  %1767 = vmatprep.mubr.msk.f32.mxu1 %vm1957_vm0, %v1956_v0 }
 0x3ee   :  { %v877_v50 = vmul.f32 %v1856_v49, %v1840_v24  ;;  %1775 = vmatprep.subr.mxu1 %v1956_v0 }
 0x3f0   :  { %v858_v51 = vpop.xlane.xlu0 %857  ;;  %1768 = vmatmul.mubr.msk.f32.vlgmr.msra.gmra.mxu1 %vm186_vm2, %v877_v50 }
 0x3f1   :  { %1861 = vrcp.f32 %v858_v51  ;;  %1777 = vmatprep.mubr.msk.f32.mxu1 %vm1957_vm0, %v1956_v0 }
 0x3f2   :  { %1863 = vrcp.f32 %v864_v45 }
 0x3f4   :  { %v1338_v52 = vpop.permute.xlu0 %1337 }
 0x3f5   :  { %v1858_v53 = vpop.eup %1857  ;;  %1776 = vmatpush3.msra.mxu1 %v1338_v52 }
 0x3f6   :  { %v879_v54 = vmul.f32 %v1858_v53, %v1842_v26  ;;  %1785 = vmatprep.subr.bf16.mxu1 %v1956_v0 }
 0x3f8   :  { %1778 = vmatmul.mubr.msk.f32.vlgmr.msra.gmra.mxu1 %vm186_vm2, %v879_v54 }
 0x3f9   :  { %1789 = vmatprep.mubr.msk.bf16.mxu1 %vm1957_vm0, %v1956_v0  ;;  %1786 = vmatpush3.bf16.msra.mxu1 %v1831_v8 }
 0x3fa   :  { %v1860_v55 = vpop.eup %1859  ;;  %1787 = vmatprep.subr.bf16.mxu1 %v1956_v0 }
 0x3fb   :  { %v876_v56 = vmul.f32 %v1860_v55, %v1846_v30 }
 0x3fd   :  { %1763 = vmatmul.mubr.msk.f32.vlgmr.msra.gmra.mxu0 %vm186_vm2, %v876_v56  ;;  %1788 = vmatpush3.bf16.msra.mxu1 %v1832_v11 }
 0x3fe   :  { %v1862_v57 = vpop.eup %1861  ;;  %1771 = vmatpush3.msra.mxu0 %v1262_v37  ;;  %1772 = vmatprep.mubr.msk.f32.mxu0 %vm1957_vm0, %v1956_v0  ;;  %v1643_v37 = vld [vmem:[%s2187_s4] ss:$0 sm:$0xff] }
 0x3ff   :  { %1780 = vmatprep.subr.mxu0 %v1956_v0  ;;  %v878_v58 = vmul.f32 %v1862_v57, %v1848_v32  ;;  %v1864_v59 = vpop.eup %1863 }
 0x400   :  { %v880_v61 = vmul.f32 %v1864_v59, %v2133_v27 }
 0x401   :  { %1773 = vmatmul.mubr.msk.f32.vlgmr.msra.gmra.mxu0 %vm186_vm2, %v878_v58 }
 0x402   :  { %1781 = vmatpush3.msra.mxu0 %v1414_v60  ;;  %1782 = vmatprep.mubr.msk.f32.mxu0 %vm1957_vm0, %v1956_v0 }
 0x405   :  { %1783 = vmatmul.mubr.msk.f32.vlgmr.msra.gmra.mxu0 %vm186_vm2, %v880_v61 }
 0x4a4   :  { %v1029_v62 = vpop.f32.mrf.mxu0 }
 0x4a6   :  { %v1754_v63 = vpop.f32.mrf.mxu0 }
 0x4a8   :  { %v953_v1 = vpop.f32.mrf.mxu1 }
 0x4aa   :  { %v1749_v2 = vpop.f32.mrf.mxu1 }
 0x4ac   :  { %v1105_v3 = vpop.f32.mrf.mxu1 }
 0x4ae   :  { %v1759_v4 = vpop.f32.mrf.mxu1 }
 0x4b0   :  { %v1257_v5 = vpop.f32.mrf.mxu1 }
 0x4b2   :  { %v1769_v6 = vpop.f32.mrf.mxu1 }
 0x4b8   :  { %v1409_v7 = vpop.f32.mrf.mxu1 }
 0x4b9   :  { %v1814_v9 = vpack.i.bf16 %v1409_v7, %v1105_v3 }
 0x4ba   :  { %v1779_v10 = vpop.f32.mrf.mxu1 }
 0x4bb   :  { %1815 = vrot.lane.b32.xlu1 %v1814_v9, %s1962_s12 }
 0x4bd   :  { %v1181_v12 = vpop.f32.mrf.mxu0 }
 0x4bf   :  { %v1764_v13 = vpop.f32.mrf.mxu0 }
 0x4c1   :  { %v1333_v14 = vpop.f32.mrf.mxu0 }
 0x4c2   :  { %v1809_v15 = vpack.i.bf16 %v1333_v14, %v1029_v62 }
 0x4c3   :  { %v1774_v16 = vpop.f32.mrf.mxu0 }
 0x4c4   :  { %1810 = vrot.lane.b32.xlu0 %v1809_v15, %s1963_s13 }
 0x4c5   :  { %v1485_v17 = vpop.f32.mrf.mxu0 }
 0x4c6   :  { %v1819_v18 = vpack.i.bf16 %v1485_v17, %v1181_v12 }
 0x4c7   :  { %v1784_v21 = vpop.f32.mrf.mxu0 }
 0x4c8   :  { %1820 = vrot.lane.b32.xlu0 %v1819_v18, %s1964_s14 }
 0x52d   :  { %v1816_v23 = vpop.permute.xlu1 %1815 }
 0x52e   :  { %v1818_v27 = vunpack.i.h.bf16 %v1816_v23  ;;  %v1817_v28 = vunpack.i.l.bf16 %v1816_v23 }
 0x536   :  { %v1811_v22 = vpop.permute.xlu0 %1810 }
 0x537   :  { %v1813_v24 = vunpack.i.h.bf16 %v1811_v22  ;;  %v1812_v25 = vunpack.i.l.bf16 %v1811_v22 }
 0x539   :  { %v1518_v0 = vsel %vm186_vm2, %v1257_v5, %v1813_v24  ;;  %v1501_v26 = vsel %vm186_vm2, %v953_v1, %v1812_v25 }
 0x53a   :  { %v1821_v29 = vpop.permute.xlu0 %1820  ;;  %v1503_v32 = vsel %vm1502_vm3, %v1501_v26, %v1817_v28  ;;  %v1519_v33 = vsel %vm1502_vm3, %v1518_v0, %v1818_v27 }
 0x53b   :  { %v1823_v30 = vunpack.i.h.bf16 %v1821_v29  ;;  %v1822_v31 = vunpack.i.l.bf16 %v1821_v29 }
 0x53d   :  { %v1520_v34 = vsel %vm1504_vm4, %v1519_v33, %v1823_v30  ;;  %v1505_v35 = vsel %vm1504_vm4, %v1503_v32, %v1822_v31 }
 0x53e   :  { %v1521_v36 = vpack.c.bf16 %v1520_v34, %v1505_v35 }
 0x540   :  { %1790 = vmatmul.mubr.msk.bf16.vlgmr.msra.gmra.mxu1 %vm1545_vm5, %v1521_v36 }
 0x600   :  { %v1583_v38 = vpop.f32.mrf.mxu1 }
 0x601   :  { %v1584_v39 = vadd.f32 %v1643_v37, %v1583_v38 }
 0x602   :  { %v1791_v40 = vpop.f32.mrf.mxu1 }
 0x603   :  { %1590 = vst.msk [vmem:[#allocation8] sm:$0xff] %vm1545_vm5, %v1584_v39 }
 0x604   :  { %v1586_v41 = vpop.f32.mrf.mxu1 }
 0x605   :  { %v1587_v42 = vadd.f32 %v1643_v37, %v1586_v41 }
 0x606   :  { %v1792_v43 = vpop.f32.mrf.mxu1 }
 0x607   :  { %1591 = vst.msk [vmem:[#allocation8 + $0x8] sm:$0xff] %vm1545_vm5, %v1587_v42 }
 0x608   :  { %1936 = shalt.err (!%p1933_p5)
}
 0x609   :  { %s1966_s20 = smov 128  }
 0x60a   :  { %1603 = dma.vmem_to_hbm [thread:$0]  %s1598_s18, 256, %s2188_s5, [#allocation4], %s1966_s20, %s1966_s20, %s1963_s13  }
 0x60b   :  { %1949 = dma.done.wait [#allocation4], 256  }
 0x60c   :  { %1950 = vsyncadd [#allocation4], 4294967040 }
 0x60d   :  { %1607 = vsyncpa [#allocation3], 1 }
 0x60e   :  { %1608 = vsyncpa [#allocation6], 1 }
 0x60f   :  { %1609 = vsyncpa [#allocation4], 1 }

</bundles_post_ra>
